<compile_context>
chip_gen: v6e
topology: v6e:2x2x1
jax: 0.10.0
libtpu: 0.0.40
codegen_flags: <defaults>
</compile_context>

<pallas_src>
import jax
import jax.numpy as jnp
from jax import lax
from jax.experimental import pallas as pl
from jax.experimental.pallas import tpu as pltpu

# ----------------------------- configuration -----------------------------
X_DIM = 64
Z_DIM = 32
NUM_CLASSES = 4
NUM_PROXIES = NUM_CLASSES * 2          # 8
SAMPLE_NUM = 8
TOPK = 8                               # must be <= N * NUM_PROXIES
SEED = 1
B = 2
N = 16                                 # feature_num (tokens per example)

_D1 = 2 * Z_DIM                        # encoder hidden width (64)
_R = max(X_DIM, _D1)                   # weight-row extent in the packed operand


def _round_up(a, m):
    return ((a + m - 1) // m) * m


def _softplus(x):
    # Numerically-stable softplus; matches torch softplus(beta=1, threshold=20)
    # to within f32 rounding.
    return jnp.maximum(x, 0.0) + jnp.log1p(jnp.exp(-jnp.abs(x)))


def _l2_normalize(v):
    # F.normalize: v / max(||v||, 1e-12)  ==  v * rsqrt(max(sum(v^2), 1e-24))
    return v * lax.rsqrt(jnp.maximum(jnp.sum(v * v, axis=-1, keepdims=True),
                                     1e-24))


# -------------------------- proxy kernel (tiny) ---------------------------
# Gridless call, 2 packed inputs, 1 packed output.
#   pem  : [P, 3*zd]   = proxies (mu | rho) | eps_mean
#   wdec : [zd+1, C]   = decoder weight rows | bias row
#   out  : [P, 4*zd+C] = mu | sigma | z_proxy | normalized(z_proxy) | logits
def _proxy_kernel(pem_ref, wdec_ref, out_ref):
    zd = Z_DIM
    mu = pem_ref[:, 0:zd]
    sigma = _softplus(pem_ref[:, zd:2 * zd])
    eps_mean = pem_ref[:, 2 * zd:3 * zd]
    z_proxy = mu + sigma * eps_mean                       # mean of samples
    logits = (jnp.dot(z_proxy, wdec_ref[0:zd, :],
                      preferred_element_type=jnp.float32)
              + wdec_ref[zd:zd + 1, :])
    out_ref[:, 0:zd] = mu
    out_ref[:, zd:2 * zd] = sigma
    out_ref[:, 2 * zd:3 * zd] = z_proxy
    out_ref[:, 3 * zd:4 * zd] = _l2_normalize(z_proxy)
    out_ref[:, 4 * zd:] = logits


def pib_proxy_call(proxies, eps_mean, w_dec, b_dec):
    P = proxies.shape[0]
    zd = Z_DIM
    C = w_dec.shape[1]
    pem = jnp.concatenate([proxies, eps_mean], axis=1)    # [P, 3*zd]
    wdec = jnp.concatenate([w_dec, b_dec], axis=0)        # [zd+1, C]
    packed = pl.pallas_call(
        _proxy_kernel,
        out_shape=jax.ShapeDtypeStruct((P, 4 * zd + C), jnp.float32),
    )(pem, wdec)
    mu = packed[:, 0:zd]
    sigma = packed[:, zd:2 * zd]
    z_proxy = packed[:, 2 * zd:3 * zd]
    zpn = packed[:, 3 * zd:4 * zd]
    logits = packed[:, 4 * zd:]
    return mu, sigma, z_proxy, zpn, logits


# -------------------- encoder + attention row kernel ----------------------
# Streams row tiles of x.  No resident state -> row axis is "parallel".
#   x   : [tm, x_dim]
#   wb  : [R+1, 2*D1+zd]  (w1 | w2 | w3 along lanes, biases in last row)
#   zpn : [P, zd]         normalized z_proxy (from the proxy kernel)
#   out : [tm, zd+P]      z | att packed (single writeback DMA per step)
def _encoder_att_kernel(x_ref, wb_ref, zpn_ref, out_ref):
    zd = Z_DIM
    # Encoder MLP (Dropout is identity in eval).  Static ref slices are free.
    h = (jnp.dot(x_ref[...], wb_ref[0:X_DIM, 0:_D1],
                 preferred_element_type=jnp.float32)
         + wb_ref[_R:_R + 1, 0:_D1])
    h = jnp.maximum(h, 0.0)
    h = (jnp.dot(h, wb_ref[0:_D1, _D1:2 * _D1],
                 preferred_element_type=jnp.float32)
         + wb_ref[_R:_R + 1, _D1:2 * _D1])
    h = jnp.maximum(h, 0.0)
    z = (jnp.dot(h, wb_ref[0:_D1, 2 * _D1:2 * _D1 + zd],
                 preferred_element_type=jnp.float32)
         + wb_ref[_R:_R + 1, 2 * _D1:2 * _D1 + zd])
    out_ref[:, 0:zd] = z
    # Attention: normalize(z) @ normalize(z_proxy)^T
    zn = _l2_normalize(z)
    out_ref[:, zd:] = lax.dot_general(
        zn, zpn_ref[...], (((1,), (1,)), ((), ())),
        preferred_element_type=jnp.float32)


def _pack_encoder_params(params):
    """Pack w1|w2|w3 (lanes) + biases (last row) into one operand."""
    def pad_rows(w):
        return jnp.pad(w, ((0, _R - w.shape[0]), (0, 0)))
    W = jnp.concatenate([pad_rows(params["w1"]), pad_rows(params["w2"]),
                         pad_rows(params["w3"])], axis=1)      # [R, 2*D1+zd]
    b = jnp.concatenate([params["b1"], params["b2"], params["b3"]],
                        axis=1)                                # [1, 2*D1+zd]
    return jnp.concatenate([W, b], axis=0)                     # [R+1, ...]


def pib_encoder_att_call(x2d, wb, zpn, *, tm_max=4096):
    """Run the row-streaming kernel on [M, x_dim]; returns z [M,zd], att [M,P]."""
    M, x_dim = x2d.shape
    zd = Z_DIM
    P = zpn.shape[0]

    # Row tiling with explicit padding guard (no silent truncation).
    tm = _round_up(min(M, tm_max), 8)
    Mp = _round_up(M, tm)
    if Mp != M:
        x2d = jnp.pad(x2d, ((0, Mp - M), (0, 0)))
    grid = (Mp // tm,)

    out = pl.pallas_call(
        _encoder_att_kernel,
        out_shape=jax.ShapeDtypeStruct((Mp, zd + P), jnp.float32),
        grid=grid,
        in_specs=[
            pl.BlockSpec((tm, x_dim), lambda i: (i, 0)),
            pl.BlockSpec(wb.shape, lambda i: (0, 0)),
            pl.BlockSpec(zpn.shape, lambda i: (0, 0)),
        ],
        out_specs=pl.BlockSpec((tm, zd + P), lambda i: (i, 0)),
        compiler_params=pltpu.CompilerParams(
            dimension_semantics=("parallel",)),
    )(x2d, wb, zpn)
    return out[:M, 0:zd], out[:M, zd:]


# ------------------------------ full forward ------------------------------
def pib_forward(x, params, *, sample_num=SAMPLE_NUM, topk=TOPK, seed=SEED):
    """PIB.forward(x) with y=None, c=None (validation/testing branch)."""
    Bx, Nx, x_dim = x.shape
    zd = Z_DIM
    P = NUM_PROXIES

    # gaussian_noise(samples=[P, sample_num], K=z_dim, seed) -- deterministic
    # standard normal (torch manual_seed RNG replaced by jax.random).
    # Only its mean over the sample axis is needed (linearity of the mean /
    # linear decoder), so reduce it here and ship [P, zd] instead of [P,S,zd].
    eps = jax.random.normal(jax.random.PRNGKey(seed), (P, sample_num, zd),
                            dtype=jnp.float32)
    eps_mean = jnp.mean(eps, axis=1)                           # [P, zd]

    # Proxy branch (tiny, one packed output).
    mu_proxy, sigma_proxy, z_proxy, zpn, decoder_logits_proxy = pib_proxy_call(
        params["proxies"], eps_mean, params["w_dec"], params["b_dec"])

    # Encoder + attention over all rows.
    wb = _pack_encoder_params(params)
    x2d = x.reshape(Bx * Nx, x_dim)
    z2d, att2d = pib_encoder_att_call(x2d, wb, zpn)
    z = z2d.reshape(Bx, Nx, zd)
    att = att2d.reshape(Bx, Nx, P)

    # ---- selection logic (plain JAX glue) ----
    # cat(unbind(att, dim=1), dim=1) == reshape(B, N*P); col j = n*P + p
    att_unbind_proxy = att.reshape(Bx, Nx * P)
    _, idx_proxy = jax.lax.top_k(att_unbind_proxy, topk)
    idx_proxy = idx_proxy % P
    # torch.mode along dim=1 (ties -> smallest value; matches argmax-first here
    # because the counted values are the proxy indices themselves)
    counts = jnp.sum(jax.nn.one_hot(idx_proxy, P, dtype=jnp.int32), axis=1)
    positive_proxy_idx = jnp.argmax(counts, axis=1)            # [B]
    mu_topk = mu_proxy[positive_proxy_idx]                     # [B, zd]
    sigma_topk = sigma_proxy[positive_proxy_idx]               # [B, zd]
    proxy_loss = None

    # cat(unbind(att, dim=2), dim=1) == transpose(0,2,1).reshape(B, P*N)
    att_unbind = jnp.transpose(att, (0, 2, 1)).reshape(Bx, P * Nx)
    _, idx_feat = jax.lax.top_k(att_unbind, topk)
    idx_feat = idx_feat % Nx                                   # feature_num
    z_topk = jnp.take_along_axis(z, idx_feat[:, :, None], axis=1)  # [B,topk,zd]

    return (decoder_logits_proxy, mu_proxy, sigma_proxy, z_topk,
            mu_topk, sigma_topk, proxy_loss)


# -------------------------- deterministic params --------------------------
def init_params(key):
    ks = jax.random.split(key, 5)

    def linear(k, fan_in, fan_out):
        kw, kb = jax.random.split(k)
        bound = 1.0 / float(fan_in) ** 0.5
        w = jax.random.uniform(kw, (fan_in, fan_out), minval=-bound,
                               maxval=bound, dtype=jnp.float32)
        b = jax.random.uniform(kb, (1, fan_out), minval=-bound,
                               maxval=bound, dtype=jnp.float32)
        return w, b

    w1, b1 = linear(ks[0], X_DIM, 2 * Z_DIM)
    w2, b2 = linear(ks[1], 2 * Z_DIM, 2 * Z_DIM)
    w3, b3 = linear(ks[2], 2 * Z_DIM, Z_DIM)
    w_dec, b_dec = linear(ks[3], Z_DIM, NUM_CLASSES)
    # xavier_uniform_ on proxies [P, 2*z_dim]
    xb = (6.0 / (NUM_PROXIES + 2 * Z_DIM)) ** 0.5
    proxies = jax.random.uniform(ks[4], (NUM_PROXIES, 2 * Z_DIM),
                                 minval=-xb, maxval=xb, dtype=jnp.float32)
    return dict(w1=w1, b1=b1, w2=w2, b2=b2, w3=w3, b3=b3,
                w_dec=w_dec, b_dec=b_dec, proxies=proxies)


# ---------------------------------- main ----------------------------------
if __name__ == "__main__":
    key = jax.random.PRNGKey(0)
    kx, kp = jax.random.split(key)
    params = init_params(kp)
    x = jax.random.normal(kx, (B, N, X_DIM), dtype=jnp.float32)

    outs = pib_forward(x, params)
    outs = jax.block_until_ready(outs)
    (decoder_logits_proxy, mu_proxy, sigma_proxy,
     z_topk, mu_topk, sigma_topk, proxy_loss) = outs

    assert decoder_logits_proxy.shape == (NUM_PROXIES, NUM_CLASSES)
    assert mu_proxy.shape == (NUM_PROXIES, Z_DIM)
    assert sigma_proxy.shape == (NUM_PROXIES, Z_DIM)
    assert z_topk.shape == (B, TOPK, Z_DIM)
    assert mu_topk.shape == (B, Z_DIM)
    assert sigma_topk.shape == (B, Z_DIM)
    assert proxy_loss is None
    assert bool(jnp.all(jnp.isfinite(decoder_logits_proxy)))
    assert bool(jnp.all(jnp.isfinite(z_topk)))
    assert bool(jnp.all(jnp.isfinite(mu_topk)))
    assert bool(jnp.all(sigma_proxy > 0.0))

    print("KERNEL_OK")
</pallas_src>

<mosaic_0001>
module attributes {stable_mosaic.version = 11 : i64} {
  func.func @_proxy_kernel(%arg0: memref<8x96xf32, #tpu.memory_space<vmem>>, %arg1: memref<33x4xf32, #tpu.memory_space<vmem>>, %arg2: memref<8x132xf32, #tpu.memory_space<vmem>>) attributes {dimension_semantics = [], scalar_prefetch = 0 : i64, scratch_operands = 0 : i64, tpu.core_type = #tpu.core_type<tc>} {
    %c0 = arith.constant 0 : index
    %c0_0 = arith.constant 0 : index
    %0 = vector.load %arg0[%c0, %c0_0] : memref<8x96xf32, #tpu.memory_space<vmem>>, vector<8x32xf32>
    %c0_1 = arith.constant 0 : index
    %c32 = arith.constant 32 : index
    %1 = vector.load %arg0[%c0_1, %c32] : memref<8x96xf32, #tpu.memory_space<vmem>>, vector<8x32xf32>
    %cst = arith.constant 0.000000e+00 : f32
    %2 = vector.broadcast %cst : f32 to vector<8x32xf32>
    %3 = arith.maximumf %1, %2 : vector<8x32xf32>
    %4 = math.absf %1 : vector<8x32xf32>
    %cst_2 = arith.constant 0.000000e+00 : f32
    %5 = vector.broadcast %cst_2 : f32 to vector<8x32xf32>
    %6 = arith.subf %5, %4 : vector<8x32xf32>
    %7 = math.exp %6 : vector<8x32xf32>
    %8 = math.log1p %7 : vector<8x32xf32>
    %9 = arith.addf %3, %8 : vector<8x32xf32>
    %c0_3 = arith.constant 0 : index
    %c64 = arith.constant 64 : index
    %10 = vector.load %arg0[%c0_3, %c64] : memref<8x96xf32, #tpu.memory_space<vmem>>, vector<8x32xf32>
    %11 = arith.mulf %9, %10 : vector<8x32xf32>
    %12 = arith.addf %0, %11 : vector<8x32xf32>
    %c0_4 = arith.constant 0 : index
    %c0_5 = arith.constant 0 : index
    %13 = vector.load %arg1[%c0_4, %c0_5] : memref<33x4xf32, #tpu.memory_space<vmem>>, vector<32x4xf32>
    %cst_6 = arith.constant dense<0.000000e+00> : vector<8x4xf32>
    %14 = tpu.matmul %12, %13, %cst_6 {dimension_numbers = #tpu.dot_dimension_numbers<[1], [0], [0], [1], [0, 0, 1, 1], [], []>} : vector<8x32xf32>, vector<32x4xf32>, vector<8x4xf32> -> vector<8x4xf32>
    %c32_7 = arith.constant 32 : index
    %c0_8 = arith.constant 0 : index
    %15 = vector.load %arg1[%c32_7, %c0_8] : memref<33x4xf32, #tpu.memory_space<vmem>>, vector<1x4xf32>
    %16 = vector.broadcast %15 : vector<1x4xf32> to vector<8x4xf32>
    %17 = arith.addf %14, %16 : vector<8x4xf32>
    %c0_9 = arith.constant 0 : index
    %c0_10 = arith.constant 0 : index
    %18 = vector.load %arg2[%c0_9, %c0_10] : memref<8x132xf32, #tpu.memory_space<vmem>>, vector<8x32xf32>
    tpu.vector_store %arg2[%c0_9, %c0_10], %0 {strides = array<i32>} : memref<8x132xf32, #tpu.memory_space<vmem>>, vector<8x32xf32>,
    %c0_11 = arith.constant 0 : index
    %c32_12 = arith.constant 32 : index
    %19 = vector.load %arg2[%c0_11, %c32_12] : memref<8x132xf32, #tpu.memory_space<vmem>>, vector<8x32xf32>
    tpu.vector_store %arg2[%c0_11, %c32_12], %9 {strides = array<i32>} : memref<8x132xf32, #tpu.memory_space<vmem>>, vector<8x32xf32>,
    %c0_13 = arith.constant 0 : index
    %c64_14 = arith.constant 64 : index
    %20 = vector.load %arg2[%c0_13, %c64_14] : memref<8x132xf32, #tpu.memory_space<vmem>>, vector<8x32xf32>
    tpu.vector_store %arg2[%c0_13, %c64_14], %12 {strides = array<i32>} : memref<8x132xf32, #tpu.memory_space<vmem>>, vector<8x32xf32>,
    %21 = arith.mulf %12, %12 : vector<8x32xf32>
    %cst_15 = arith.constant dense<0.000000e+00> : vector<8xf32>
    %22 = vector.multi_reduction <add>, %21, %cst_15 [1] : vector<8x32xf32> to vector<8xf32>
    %23 = vector.shape_cast %22 : vector<8xf32> to vector<8x1xf32>
    %cst_16 = arith.constant 1.000000e-24 : f32
    %24 = vector.broadcast %cst_16 : f32 to vector<8x1xf32>
    %25 = arith.maximumf %23, %24 : vector<8x1xf32>
    %26 = math.rsqrt %25 : vector<8x1xf32>
    %27 = vector.broadcast %26 : vector<8x1xf32> to vector<8x32xf32>
    %28 = arith.mulf %12, %27 : vector<8x32xf32>
    %c0_17 = arith.constant 0 : index
    %c96 = arith.constant 96 : index
    %29 = vector.load %arg2[%c0_17, %c96] : memref<8x132xf32, #tpu.memory_space<vmem>>, vector<8x32xf32>
    tpu.vector_store %arg2[%c0_17, %c96], %28 {strides = array<i32>} : memref<8x132xf32, #tpu.memory_space<vmem>>, vector<8x32xf32>,
    %c0_18 = arith.constant 0 : index
    %c128 = arith.constant 128 : index
    %30 = vector.load %arg2[%c0_18, %c128] : memref<8x132xf32, #tpu.memory_space<vmem>>, vector<8x4xf32>
    tpu.vector_store %arg2[%c0_18, %c128], %17 {strides = array<i32>} : memref<8x132xf32, #tpu.memory_space<vmem>>, vector<8x4xf32>,
    return
  }
}

</mosaic_0001>

<bundles_post_ra>
// kernel: tpu_custom_call.1
= control target key start
LH: loop header
LB: loop body
LE: loop exit
PB: predicated region body
PF: predicated region fallthrough
CT: control target
= control target key end

     0   :  { %s209_s13 = smov 96   ;;  %v210_v2 = vmov 0.0   ;;  %s256_s0 = inlined_call_operand.vmem [shape: f32[8,96], index: 0, kind: input, shape index: {}]   ;;  %s257_s1 = inlined_call_operand.vmem [shape: f32[33,4], index: 1, kind: input, shape index: {}]   ;;  %s258_s2 = inlined_call_operand.hbm [shape: f32[8,132], index: 2, kind: output, shape index: {}]  }
   0x1   :  { %v12_v0 = vld [vmem:[%s256_s0] sm:$0xff]  ;;  %v41_v1 = vld [vmem:[%s257_s1 + $0x18] sm:$0xff]  ;;  %165 = vmatprep.subr.mxu0 %v210_v2  ;;  %v40_v3 = vld [vmem:[%s257_s1 + $0x10] sm:$0xff] }
   0x2   :  { %29 = vrot.lane.b32.xlu0 %v12_v0, %s209_s13 }
   0x3   :  { %7 = vsyncpa [#allocation3], 0  ;;  %166 = vmatpush3.msra.mxu0 %v41_v1  ;;  %v39_v4 = vld [vmem:[%s257_s1 + $0x8] sm:$0xff]  ;;  %v14_v5 = vand.u32 2147483647, %v12_v0  ;;  %v38_v16 = vld [vmem:[%s257_s1] sm:$0xff] }
   0x4   :  { %167 = vmatprep.subr.mxu0 %v210_v2  ;;  %vm47_vm0 = vcmask 261120   ;;  %vm211_vm2 = vmmov 0   ;;  %v13_v17 = vmax.f32 %v12_v0, 0.0  ;;  %vm122_vm3 = vcmask 523520   ;;  %s212_s19 = smov 64   ;;  %s213_s22 = smov [#allocation2]  }
   0x5   :  { %168 = vmatpush3.msra.mxu0 %v40_v3  ;;  %v15_v6 = vsub.f32 0.0, %v14_v5  ;;  %173 = vmatprep.mubr.msk.f32.mxu0 %vm211_vm2, %v210_v2  ;;  %121 = vst.msk [vmem:[#allocation2] sm:$0xff] %vm47_vm0, %v12_v0  ;;  %vm127_vm4 = vcmask 785920   ;;  %v158_v31 = vld [vmem:[%s257_s1 + $0x20] ss:$0 sm:$0xff]  ;;  %vm142_vm5 = vcmask 31744  }
   0x6   :  { %169 = vmatprep.subr.mxu0 %v210_v2  ;;  %s150_s23 = sshll.u32 %s213_s22, 4  ;;  %vm140_vm6 = vcmask 1048320   ;;  %s151_s23 = int_to_ptr.vmem [resolvable:$true] %s150_s23 }
   0x7   :  { %170 = vmatpush3.msra.mxu0 %v39_v4  ;;  %v16_v7 = vmul.f32 1.442695, %v15_v6  ;;  %s187_s24 = scalar_lea.vmem %s151_s23, 256  ;;  %p192_p1 = scmp.lt.s32.totalorder %s151_s23, %s151_s23 }
   0x8   :  { %171 = vmatprep.subr.mxu0 %v210_v2  ;;  %p188_p0 = scmp.ne.s32.totalorder %s151_s23, %s187_s24  ;;  %p193_p2 = scmp.lt.s32.totalorder %s187_s24, %s187_s24 }
   0x9   :  { %181 = vpow2.f32 %v16_v7  ;;  %172 = vmatpush3.msra.mxu0 %v38_v16 }
   0xa   :  { %p194_p3 = por %p193_p2, %p192_p1 }
   0xc   :  { %p195_p4 = pnand %p194_p3, %p188_p0 }
  0x16   :  { %v182_v8 = vpop.eup %181 }
  0x17   :  { %v18_v9 = vadd.f32 1.0, %v182_v8  ;;  %v21_v10 = vmul.f32 -0.5, %v182_v8  ;;  %v24_v13 = vand.u32 2147483647, %v182_v8 }
  0x19   :  { %183 = vlog2.f32 %v18_v9  ;;  %v22_v11 = vadd.f32 1.0, %v21_v10  ;;  %vm25_vm1 = vcmp.lt.f32.partialorder %v24_v13, 0.0004427343 }
  0x1b   :  { %v23_v15 = vmul.f32 %v182_v8, %v22_v11 }
  0x26   :  { %v184_v12 = vpop.eup %183 }
  0x27   :  { %v20_v14 = vmul.f32 0.6931472, %v184_v12 }
  0x29   :  { %v26_v18 = vsel %vm25_vm1, %v23_v15, %v20_v14 }
  0x2a   :  { %v27_v19 = vadd.f32 %v26_v18, %v13_v17 }
  0x2c   :  { %123 = vst.msk [vmem:[#allocation2] sm:$0xff] %vm122_vm3, %v27_v19 }
  0x74   :  { %v30_v20 = vpop.permute.xlu0 %29 }
  0x75   :  { %v32_v21 = vmul.f32 %v30_v20, %v27_v19 }
  0x77   :  { %34 = vrot.lane.b32.xlu0 %v32_v21, %s209_s13 }
  0xe9   :  { %v35_v22 = vpop.permute.xlu0 %34 }
  0xea   :  { %v37_v23 = vadd.f32 %v35_v22, %v12_v0 }
  0xec   :  { %174 = vmatmul.mubr.msk.f32.vlgmr.msra.gmra.mxu0 %vm47_vm0, %v37_v23  ;;  %v129_v24 = vmul.f32 %v37_v23, %v37_v23 }
  0xee   :  { %v130_v25 = vsel %vm47_vm0, %v129_v24, 0.0 }
  0xef   :  { %131 = vadd.xlane.f32.xlu1 %v130_v25 }
 0x100   :  { %124 = vrot.lane.b32.xlu1 %v37_v23, %s212_s19 }
 0x178   :  { %v132_v26 = vpop.xlane.xlu1 %131 }
 0x179   :  { %v133_v27 = vmax.f32 %v132_v26, 1e-24 }
 0x17b   :  { %185 = vrsqrt.f32 %v133_v27 }
 0x17c   :  { %v125_v28 = vpop.permute.xlu1 %124 }
 0x17d   :  { %128 = vst.msk [vmem:[#allocation2] sm:$0xff] %vm127_vm4, %v125_v28 }
 0x188   :  { %v186_v29 = vpop.eup %185 }
 0x189   :  { %v135_v30 = vmul.f32 %v186_v29, %v37_v23 }
 0x18b   :  { %137 = vrot.lane.b32.xlu0 %v135_v30, %s209_s13 }
 0x1ac   :  { %v117_v32 = vpop.f32.mrf.mxu0 }
 0x1ad   :  { %v118_v33 = vadd.f32 %v158_v31, %v117_v32 }
 0x1ae   :  { %v175_v34 = vpop.f32.mrf.mxu0 }
 0x1af   :  { %143 = vst.msk [vmem:[#allocation2 + $0x8] sm:$0xff] %vm142_vm5, %v118_v33 }
 0x1fd   :  { %v138_v35 = vpop.permute.xlu0 %137 }
 0x1fe   :  { %141 = vst.msk [vmem:[#allocation2] sm:$0xff] %vm140_vm6, %v138_v35 }
 0x1ff   :  { %198 = shalt.err (!%p195_p4)
}
 0x200   :  { %153 = dma.vmem_to_hbm [thread:$0]  %s151_s23, 256, %s258_s2, [#allocation3]  }
 0x201   :  { %207 = dma.done.wait [#allocation3], 256  }
 0x202   :  { %208 = vsyncadd [#allocation3], 4294967040 }
 0x203   :  { %157 = vsyncpa [#allocation3], 1 }

</bundles_post_ra>
